<compile_context>
chip_gen: v7x
topology: tpu7x:2x2x1
jax: 0.10.0
libtpu: 0.0.40
codegen_flags: <defaults>
</compile_context>

<pallas_src>
import functools

import jax
import jax.numpy as jnp
from jax.experimental import pallas as pl
from jax.experimental.pallas import tpu as pltpu


# ---------------------------------------------------------------------------
# Fused single-pass kernel: one read of x, one write of x*gate per block.
# ---------------------------------------------------------------------------
def _se_fused_kernel(x_ref, w1t_ref, w2t_ref, o_ref):
    # x_ref : [Bt, C, HW]   (HW on the lane axis -> lane-dense stores)
    # w1t   : [C, Cr], w2t : [Cr, C]  (pre-transposed, resident in VMEM)
    x = x_ref[...]
    # Squeeze: global average pool over spatial positions (lane-axis reduce),
    # accumulated in f32 regardless of activation dtype.
    mean = jnp.mean(x.astype(jnp.float32), axis=2)                      # [Bt, C]
    # Excitation: fc1 -> ReLU -> fc2 -> sigmoid (tiny MXU matmuls).
    h = jnp.maximum(
        jnp.dot(mean, w1t_ref[...], preferred_element_type=jnp.float32), 0.0)
    y = jax.nn.sigmoid(
        jnp.dot(h, w2t_ref[...], preferred_element_type=jnp.float32))   # [Bt, C]
    # Scale: broadcast the per-(batch, channel) gate over the lane axis.
    o_ref[...] = (x * y[:, :, None]).astype(o_ref.dtype)


# ---------------------------------------------------------------------------
# Two-pass fallback for large-HW layers whose single slab would blow VMEM.
# Pass 1: HW-tiled partial sums -> gate [B, C];  Pass 2: HW-tiled scale.
# ---------------------------------------------------------------------------
def _se_gate_kernel(x_ref, w1t_ref, w2t_ref, y_ref, *, inv_hw):
    hw_i = pl.program_id(0)

    @pl.when(hw_i == 0)
    def _():
        y_ref[...] = jnp.zeros_like(y_ref)

    # Accumulate channel sums for this HW tile (f32 accumulation).
    y_ref[...] += jnp.sum(x_ref[...].astype(jnp.float32), axis=2)       # [B, C]

    @pl.when(hw_i == pl.num_programs(0) - 1)
    def _():
        mean = y_ref[...] * inv_hw
        h = jnp.maximum(
            jnp.dot(mean, w1t_ref[...], preferred_element_type=jnp.float32), 0.0)
        y_ref[...] = jax.nn.sigmoid(
            jnp.dot(h, w2t_ref[...], preferred_element_type=jnp.float32))


def _se_scale_kernel(x_ref, y_ref, o_ref):
    o_ref[...] = (x_ref[...].astype(jnp.float32) * y_ref[...][:, :, None]
                  ).astype(o_ref.dtype)


# ---------------------------------------------------------------------------
# Generation-aware VMEM budgeting.
# ---------------------------------------------------------------------------
def _vmem_budget():
    """Returns (target_block_bytes, vmem_limit_bytes) for this TPU generation."""
    try:
        vmem_cap = int(pltpu.get_tpu_info().vmem_capacity_bytes)
    except Exception:
        vmem_cap = 64 * 1024 * 1024          # conservative: v7x per-TensorCore
    vmem_cap = max(32 * 1024 * 1024, min(vmem_cap, 128 * 1024 * 1024))
    # v7x (64 MiB): limit 56 MiB, ~12 MiB blocks.  v5e/v6e (128 MiB): limit
    # 100 MiB, ~23 MiB blocks.  Working set ~= 2 x (in + out) blocks
    # (double-buffered) + resident weights + compiler scratch.
    vmem_limit = min((vmem_cap * 7) // 8, 100 * 1024 * 1024)
    target_block_bytes = max((vmem_limit - 8 * 1024 * 1024) // 4, 1 << 20)
    return target_block_bytes, vmem_limit


def _pick_hw_tile(B, C, HW, itemsize, target_block_bytes):
    """Largest lane-aligned (x128) HW tile that divides HW and fits the budget."""
    if HW % 128 != 0:
        return None
    max_hw = (target_block_bytes // max(B * C * itemsize, 1)) // 128 * 128
    hw_t = min(HW, max(max_hw, 128))
    while hw_t >= 128 and HW % hw_t != 0:
        hw_t -= 128
    return hw_t if hw_t >= 128 else None


def _se_two_pass(x, w1t, w2t, target_block_bytes, vmem_limit, hw_tile=None):
    B, C, HW = x.shape
    itemsize = x.dtype.itemsize
    hw_t = hw_tile if hw_tile is not None else _pick_hw_tile(
        B, C, HW, itemsize, target_block_bytes)
    if hw_t is None or HW % hw_t != 0:
        # TODO(synk): HW not 128-tileable; mask/pad the partial HW tile instead
        # of processing it as one full-width block.
        hw_t = HW
    n_hw = HW // hw_t

    # Pass 1: pooled + excited gate y[B, C] in f32.
    gate = pl.pallas_call(
        functools.partial(_se_gate_kernel, inv_hw=1.0 / HW),
        out_shape=jax.ShapeDtypeStruct((B, C), jnp.float32),
        grid_spec=pltpu.PrefetchScalarGridSpec(
            num_scalar_prefetch=0,
            grid=(n_hw,),
            in_specs=[
                pl.BlockSpec((B, C, hw_t), lambda h: (0, 0, h)),
                pl.BlockSpec(w1t.shape, lambda h: (0, 0)),
                pl.BlockSpec(w2t.shape, lambda h: (0, 0)),
            ],
            out_specs=pl.BlockSpec((B, C), lambda h: (0, 0)),
        ),
        compiler_params=pltpu.CompilerParams(
            dimension_semantics=("arbitrary",),       # HW is a reduction axis
            vmem_limit_bytes=vmem_limit,
        ),
    )(x, w1t, w2t)

    # Pass 2: HW-tiled broadcast scale.
    return pl.pallas_call(
        _se_scale_kernel,
        out_shape=jax.ShapeDtypeStruct((B, C, HW), x.dtype),
        grid_spec=pltpu.PrefetchScalarGridSpec(
            num_scalar_prefetch=0,
            grid=(n_hw,),
            in_specs=[
                pl.BlockSpec((B, C, hw_t), lambda h: (0, 0, h)),
                pl.BlockSpec((B, C), lambda h: (0, 0)),
            ],
            out_specs=pl.BlockSpec((B, C, hw_t), lambda h: (0, 0, h)),
        ),
        compiler_params=pltpu.CompilerParams(
            dimension_semantics=("parallel",),
            vmem_limit_bytes=vmem_limit,
        ),
    )(x, gate)


# ---------------------------------------------------------------------------
# Public wrapper.
# ---------------------------------------------------------------------------
def se_block(x_nchw, w1, w2, *, force_two_pass=False, hw_tile=None):
    """SE block forward (matches the PyTorch SEBlock module, bias-free fc).

    x_nchw: [B, C, H, W] activations.
    w1:     [C//r, C]  (PyTorch Linear weight layout, fc1)
    w2:     [C, C//r]  (fc2)
    """
    B, C, H, W = x_nchw.shape
    HW = H * W

    # NCHW-native: free reshape only, no HBM transpose in or out.
    x = x_nchw.reshape(B, C, HW)
    w1t = jnp.transpose(w1)     # [C, Cr]  (tiny, stays resident)
    w2t = jnp.transpose(w2)     # [Cr, C]

    target_block_bytes, vmem_limit = _vmem_budget()
    slab_bytes = C * HW * x.dtype.itemsize              # one batch element

    # Block several batch elements per grid step (MB-scale DMAs) ...
    bt = max(1, min(B, target_block_bytes // max(slab_bytes, 1)))
    # ... but keep >= min(B, 4) grid steps so software pipelining works and
    # v7x's two TensorCores both get work ("parallel" batch axis).
    bt = min(bt, max(1, B // min(B, 4)))
    while B % bt != 0:
        bt -= 1

    fused_fits = (bt * slab_bytes) <= target_block_bytes and not force_two_pass

    if fused_fits:
        out = pl.pallas_call(
            _se_fused_kernel,
            out_shape=jax.ShapeDtypeStruct((B, C, HW), x.dtype),
            grid_spec=pltpu.PrefetchScalarGridSpec(
                num_scalar_prefetch=0,
                grid=(B // bt,),
                in_specs=[
                    pl.BlockSpec((bt, C, HW), lambda b: (b, 0, 0)),
                    pl.BlockSpec(w1t.shape, lambda b: (0, 0)),
                    pl.BlockSpec(w2t.shape, lambda b: (0, 0)),
                ],
                out_specs=pl.BlockSpec((bt, C, HW), lambda b: (b, 0, 0)),
            ),
            compiler_params=pltpu.CompilerParams(
                dimension_semantics=("parallel",),
                vmem_limit_bytes=vmem_limit,
            ),
        )(x, w1t, w2t)
    else:
        # Single [C, HW] slab (or requested path) does not fit the budget:
        # HW-tiled pooling pass + HW-tiled scale pass.
        out = _se_two_pass(x, w1t, w2t, target_block_bytes, vmem_limit,
                           hw_tile=hw_tile)

    return out.reshape(B, C, H, W)


def se_block_ref(x, w1, w2):
    """Pure-JAX reference mirroring the PyTorch forward."""
    y = jnp.mean(x, axis=(2, 3))                         # [B, C]
    y = jnp.maximum(y @ w1.T, 0.0)                       # [B, C//r]
    y = jax.nn.sigmoid(y @ w2.T)                         # [B, C]
    return x * y[:, :, None, None]


if __name__ == "__main__":
    B, C, H, W = 2, 32, 16, 16
    reduction = 16
    Cr = C // reduction

    key = jax.random.PRNGKey(0)
    kx, k1, k2 = jax.random.split(key, 3)
    x = jax.random.normal(kx, (B, C, H, W), dtype=jnp.float32)
    # Deterministic synthetic weights (PyTorch Linear layout: [out, in]).
    w1 = jax.random.normal(k1, (Cr, C), dtype=jnp.float32) * 0.1
    w2 = jax.random.normal(k2, (C, Cr), dtype=jnp.float32) * 0.1

    ref = se_block_ref(x, w1, w2)

    # Fused single-pass path (default for these shapes).
    out = jax.block_until_ready(se_block(x, w1, w2))
    assert out.shape == (B, C, H, W)
    assert jnp.allclose(out, ref, atol=1e-5, rtol=1e-5)

    # Also exercise the HW-tiled two-pass fallback (used when a single slab
    # would not fit v7x's 64 MiB VMEM), with a 2-step HW grid.
    out2 = jax.block_until_ready(
        se_block(x, w1, w2, force_two_pass=True, hw_tile=128))
    assert jnp.allclose(out2, ref, atol=1e-5, rtol=1e-5)

    print("KERNEL_OK")
</pallas_src>

<mosaic_0001>
module attributes {stable_mosaic.version = 11 : i64} {
  func.func @_se_fused_kernel(%arg0: i32, %arg1: memref<1x32x256xf32, #tpu.memory_space<vmem>>, %arg2: memref<32x2xf32, #tpu.memory_space<vmem>>, %arg3: memref<2x32xf32, #tpu.memory_space<vmem>>, %arg4: memref<1x32x256xf32, #tpu.memory_space<vmem>>) attributes {dimension_semantics = [#tpu.dimension_semantics<parallel>], iteration_bounds = array<i64: 2>, scalar_prefetch = 0 : i64, scratch_operands = 0 : i64, tpu.core_type = #tpu.core_type<tc>, window_params = [{transform_indices = @transform_0, window_bounds = array<i64: 1, 32, 256>}, {pipeline_mode = #tpu.pipeline_mode<synchronous>, transform_indices = @transform_1, window_bounds = array<i64: 32, 2>}, {pipeline_mode = #tpu.pipeline_mode<synchronous>, transform_indices = @transform_2, window_bounds = array<i64: 2, 32>}, {transform_indices = @transform_3, window_bounds = array<i64: 1, 32, 256>}]} {
    %c0 = arith.constant 0 : index
    %c0_0 = arith.constant 0 : index
    %c0_1 = arith.constant 0 : index
    %0 = vector.load %arg1[%c0, %c0_0, %c0_1] : memref<1x32x256xf32, #tpu.memory_space<vmem>>, vector<1x32x256xf32>
    %cst = arith.constant dense<0.000000e+00> : vector<1x32xf32>
    %1 = vector.multi_reduction <add>, %0, %cst [2] : vector<1x32x256xf32> to vector<1x32xf32>
    %cst_2 = arith.constant 2.560000e+02 : f32
    %2 = vector.broadcast %cst_2 : f32 to vector<1x32xf32>
    %3 = arith.divf %1, %2 : vector<1x32xf32>
    %c0_3 = arith.constant 0 : index
    %c0_4 = arith.constant 0 : index
    %4 = vector.load %arg2[%c0_3, %c0_4] : memref<32x2xf32, #tpu.memory_space<vmem>>, vector<32x2xf32>
    %cst_5 = arith.constant dense<0.000000e+00> : vector<1x2xf32>
    %5 = tpu.matmul %3, %4, %cst_5 {dimension_numbers = #tpu.dot_dimension_numbers<[1], [0], [0], [1], [0, 0, 1, 1], [], []>} : vector<1x32xf32>, vector<32x2xf32>, vector<1x2xf32> -> vector<1x2xf32>
    %cst_6 = arith.constant 0.000000e+00 : f32
    %6 = vector.broadcast %cst_6 : f32 to vector<1x2xf32>
    %7 = arith.maximumf %5, %6 : vector<1x2xf32>
    %c0_7 = arith.constant 0 : index
    %c0_8 = arith.constant 0 : index
    %8 = vector.load %arg3[%c0_7, %c0_8] : memref<2x32xf32, #tpu.memory_space<vmem>>, vector<2x32xf32>
    %cst_9 = arith.constant dense<0.000000e+00> : vector<1x32xf32>
    %9 = tpu.matmul %7, %8, %cst_9 {dimension_numbers = #tpu.dot_dimension_numbers<[1], [0], [0], [1], [0, 0, 1, 1], [], []>} : vector<1x2xf32>, vector<2x32xf32>, vector<1x32xf32> -> vector<1x32xf32>
    %10 = arith.negf %9 : vector<1x32xf32>
    %11 = math.exp %10 : vector<1x32xf32>
    %cst_10 = arith.constant 1.000000e+00 : f32
    %12 = vector.broadcast %cst_10 : f32 to vector<1x32xf32>
    %13 = arith.addf %12, %11 : vector<1x32xf32>
    %14 = arith.divf %12, %13 : vector<1x32xf32>
    %15 = vector.shape_cast %14 : vector<1x32xf32> to vector<1x32x1xf32>
    %16 = vector.broadcast %15 : vector<1x32x1xf32> to vector<1x32x256xf32>
    %17 = arith.mulf %0, %16 : vector<1x32x256xf32>
    %c0_11 = arith.constant 0 : index
    %c0_12 = arith.constant 0 : index
    %c0_13 = arith.constant 0 : index
    %18 = vector.load %arg4[%c0_11, %c0_12, %c0_13] : memref<1x32x256xf32, #tpu.memory_space<vmem>>, vector<1x32x256xf32>
    tpu.vector_store %arg4[%c0_11, %c0_12, %c0_13], %17 {strides = array<i32>} : memref<1x32x256xf32, #tpu.memory_space<vmem>>, vector<1x32x256xf32>,
    return
  }
  func.func @transform_0(%arg0: i32) -> (i32, i32, i32) {
    %c0_i32 = arith.constant 0 : i32
    %c0_i32_0 = arith.constant 0 : i32
    %c0_i32_1 = arith.constant 0 : i32
    return %arg0, %c0_i32, %c0_i32_0 : i32, i32, i32
  }
  func.func @transform_1(%arg0: i32) -> (i32, i32) {
    %c0_i32 = arith.constant 0 : i32
    %c0_i32_0 = arith.constant 0 : i32
    %c0_i32_1 = arith.constant 0 : i32
    return %c0_i32, %c0_i32_0 : i32, i32
  }
  func.func @transform_2(%arg0: i32) -> (i32, i32) {
    %c0_i32 = arith.constant 0 : i32
    %c0_i32_0 = arith.constant 0 : i32
    %c0_i32_1 = arith.constant 0 : i32
    return %c0_i32, %c0_i32_0 : i32, i32
  }
  func.func @transform_3(%arg0: i32) -> (i32, i32, i32) {
    %c0_i32 = arith.constant 0 : i32
    %c0_i32_0 = arith.constant 0 : i32
    %c0_i32_1 = arith.constant 0 : i32
    return %arg0, %c0_i32, %c0_i32_0 : i32, i32, i32
  }
}

</mosaic_0001>

<bundles_post_ra>
// kernel: tpu_custom_call.1
= control target key start
LH: loop header
LB: loop body
LE: loop exit
PB: predicated region body
PF: predicated region fallthrough
CT: control target
= control target key end

     0   :  { %8 = vsyncpa [#allocation3], 0  ;;  %s976_s0 = inlined_call_operand.hbm [shape: f32[2,32,256], index: 0, kind: input, shape index: {}]   ;;  %s977_s1 = inlined_call_operand.vmem [shape: f32[32,2], index: 1, kind: input, shape index: {}]   ;;  %s978_s2 = inlined_call_operand.vmem [shape: f32[2,32], index: 2, kind: input, shape index: {}]   ;;  %s979_s3 = inlined_call_operand.hbm [shape: f32[2,32,256], index: 3, kind: output, shape index: {}]  }
   0x1   :  { %10 = vsyncpa [#allocation3 + $0x1], 0 }
   0x2   :  { %11 = vsyncpa [#allocation4], 0 }
   0x3   :  { %13 = vsyncpa [#allocation4 + $0x1], 0  ;;  %s763_s12 = smov 0   ;;  %s765_s13 = smov 0  }
   0x4   :  { %s767_s14 = smov 0   ;;  %s769_s15 = smov 0  }
   0x5 LB: > { %s784_s16 = sadd.s32 4294967295, %s732_s15   ;;  %s530_s17 = sadd.s32 4294967294, %s732_s15   ;;  %s732_s15 = sphi %s769_s15, %s992_s15   ;;  %s728_s14 = sphi %s767_s14, %s991_s14   ;;  %s724_s13 = sphi %s765_s13, %s990_s13   ;;  %s720_s12 = sphi %s763_s12, %s989_s12  }
   0x6   : > { %s788_s18 = sadd.s32 1, %s732_s15   ;;  %s26_s19 = sadd.s32 1, %s728_s14 }
   0x7   : > { %s23_s20 = ssub.s32 %s732_s15, %s788_s18  ;;  %p33_p0 = scmp.ne.s32.totalorder %s728_s14, %s724_s13 }
   0x8   : > { %p24_p1 = scmp.eq.s32.totalorder %s23_s20, 0  ;;  %p34_p2 = scmp.eq.s32.totalorder %s732_s15, 0 }
   0x9   : > { %p39_p3 = scmp.ne.s32.totalorder %s724_s13, %s720_s12  ;;  %p40_p4 = scmp.eq.s32.totalorder %s784_s16, 0 }
   0xa   : > { %s800_s21 = scalar_select %p24_p1, %s728_s14, %s26_s19  }
   0xb   : > { %p802_p5 = por %p34_p2, %p33_p0  ;;  %p806_p6 = por %p40_p4, %p39_p3 }
   0xc   : > { %p105_p7 = scmp.eq.s32.totalorder %s784_s16, 1  ;;  %p111_p8 = scmp.eq.s32.totalorder %s530_s17, 1 }
   0xd   : > { %p591_p10 = scmp.lt.s32.totalorder %s732_s15, 2  ;;  %s137_s26 = sand.u32 1, %s728_s14  }
   0xe   : > { %p813_p11 = por %p105_p7, %p33_p0  ;;  %p817_p12 = por %p111_p8, %p39_p3 }
   0xf   : > { %s548_s27 = sshll.u32 %s732_s15, 10  ;;  %s533_s28 = sshll.u32 %s137_s26, 6 }
  0x10   : > { %s983_s24 = scalar_select %p813_p11, 1, 0 }
  0x11   : > { %s984_s25 = scalar_select %p817_p12, 1, 0 }
  0x12   : > { %s826_s4 = scalar_lea.hbm %s976_s0, %s548_s27  ;;  %s141_s5 = scalar_lea.vmem [#allocation2], %s533_s28 }
  0x13   : > { %s148_s6 = sshll.u32 %s141_s5, 4  ;;  %p830_p13 = pnand %p591_p10, %p802_p5  ;;  %s834_s6 = int_to_ptr.vmem [resolvable:$true] %s148_s6 }
  0x14   : > { %s836_s8 = scalar_lea.sflag [#allocation3], %s137_s26  ;;  %s636_s9 = scalar_lea.hbm %s826_s4, 1024 }
  0x15   : > { %p637_p0 = scmp.ne.s32.totalorder %s826_s4, %s636_s9  ;;  %p638_p1 = pneg %p830_p13 }
  0x16   : > { %s641_s17 = scalar_lea.hbm %s976_s0, 2048  ;;  %p642_p4 = scmp.lt.u32.totalorder %s826_s4, %s976_s0 }
  0x17   : > { %p639_p2 = pnand %p638_p1, %p637_p0  ;;  %p643_p5 = scmp.lt.u32.totalorder %s641_s17, %s636_s9 }
  0x18   : > { %p645_p8 = scmp.lt.u32.totalorder %s636_s9, %s826_s4 }
  0x19   : > { %p640_p3 = pneg %p639_p2  ;;  %p644_p7 = por %p643_p5, %p642_p4 }
  0x1b   : > { %p646_p10 = por %p645_p8, %p644_p7 }
  0x1d   : > { %p647_p9 = pnand %p646_p10, %p640_p3 }
  0x1f   : > { %650 = shalt.err (!%p647_p9)
}
  0x20   : > { %s651_s22 = scalar_lea.vmem %s834_s6, 1024  ;;  %s734_s26 = smov [#allocation2]  }
  0x21   : > { %p652_p0 = scmp.ne.s32.totalorder %s834_s6, %s651_s22  ;;  %s656_s27 = sshll.u32 %s734_s26, 4  ;;  %s657_s27 = int_to_ptr.vmem [resolvable:$false] %s656_s27 }
  0x22   : > { %s658_s28 = scalar_lea.vmem %s657_s27, 2048  ;;  %p659_p11 = scmp.lt.s32.totalorder %s834_s6, %s657_s27 }
  0x23   : > { %p654_p2 = pnand %p652_p0, %p638_p1  ;;  %p660_p4 = scmp.lt.s32.totalorder %s658_s28, %s651_s22 }
  0x25   : > { %p655_p12 = pneg %p654_p2  ;;  %p661_p5 = por %p660_p4, %p659_p11 }
  0x27   : > { %p662_p7 = pnand %p661_p5, %p655_p12 }
  0x29   : > { %665 = shalt.err (!%p662_p7)
}
  0x2a   : > { %s735_s29 = smov 256   ;;  %s736_s30 = smov 16  }
  0x2b   : > { %586 = dma.hbm_to_vmem [thread:$0]  (!%p830_p13), %s826_s4, 1024, %s834_s6, %s836_s8, %s735_s29, %s735_s29, %s736_s30  }
  0x2c   : > { %p536_p9 = scmp.ge.s32.totalorder %s732_s15, 1  ;;  %p156_p1 = scmp.lt.s32.totalorder %s732_s15, 3 }
  0x2e   : > { %p157_p3 = pnand %p536_p9, %p156_p1 }
  0x2f   : > { %s867_s5 = sand.u32 (!%p157_p3), 1, %s724_s13  }
  0x30   : > { %160 = sbr.rel (%p157_p3) target bundleno = 806 (0x326), region = 32  ;;  %s537_s9 = sshll.u32 (!%p157_p3), %s867_s5, 6 }
  0x31   : > { %s163_s10 = scalar_lea.sflag (!%p157_p3), [#allocation3], %s867_s5  ;;  %s166_s11 = scalar_lea.vmem (!%p157_p3), [#allocation2], %s537_s9 }
  0x37   : > { %711 = dma.done.wait (%p806_p6), %s163_s10, 1024  }
  0x38   : > { %713 = vsyncadd (%p806_p6), %s163_s10, 4294966272  ;;  %v877_v0 = vld [vmem:[%s166_s11] sm:$0xff]  ;;  %v879_v1 = vld [vmem:[%s166_s11 + $0x8] sm:$0xff]  ;;  %v737_v15 = vmov 0.0|0.0   ;;  %vm738_vm0 = vmmov 0   ;;  %v739_v19 = vmov 0.0   ;;  %v222_v20 = vlaneseq }
  0x39   : > { %v881_v2 = vld [vmem:[%s166_s11 + $0x20] sm:$0xff]  ;;  %v197_v3 = vadd.f32 %v879_v1, %v877_v0  ;;  %v885_v4 = vld [vmem:[%s166_s11 + $0x28] sm:$0xff]  ;;  %v887_v5 = vld [vmem:[%s166_s11 + $0x10] sm:$0xff]  ;;  %573 = vmatprep.subr.bf16.mxu0 %v737_v15  ;;  %565 = vmatprep.mubr.msk.f32.mxu0 %vm738_vm0, %v739_v19  ;;  %vm233_vm1 = vcmask 130112   ;;  %vm240_vm2 = vcmask 195712   ;;  %vm247_vm3 = vcmask 261312  }
  0x3a   : > { %v889_v6 = vld [vmem:[%s166_s11 + $0x18] sm:$0xff]  ;;  %v203_v7 = vadd.f32 %v885_v4, %v881_v2  ;;  %v893_v8 = vld [vmem:[%s166_s11 + $0x30] sm:$0xff]  ;;  %v214_v12 = vld [vmem:[%s977_s1] sm:$0xff]  ;;  %568 = vmatprep.subr.mxu1 %v739_v19  ;;  %570 = vmatprep.mubr.msk.f32.mxu1 %vm738_vm0, %v739_v19  ;;  %v223_v21 = vand.u32 127, %v222_v20  ;;  %v225_v22 = vshrl.u32 %v222_v20, 7  ;;  %vm249_vm4 = vcmask 261120  }
  0x3b   : > { %v895_v9 = vld [vmem:[%s166_s11 + $0x38] sm:$0xff]  ;;  %198 = vadd.xlane.f32.xlu0 %v197_v3  ;;  %v200_v10 = vadd.f32 %v889_v6, %v887_v5  ;;  %v215_v13 = vld [vmem:[%s977_s1 + $0x8] sm:$0xff]  ;;  %v216_v16 = vld [vmem:[%s977_s1 + $0x10] sm:$0xff]  ;;  %vm328_vm5 = vcmask 1041408   ;;  %vm324_vm6 = vcmask 15360   ;;  %s188_s27 = scalar_lea.vmem [#allocation5], %s537_s9 }
  0x3c   : > { %204 = vadd.xlane.f32.xlu1 %v203_v7  ;;  %v206_v11 = vadd.f32 %v895_v9, %v893_v8  ;;  %v574_v14 = vpack.c.bf16 %v215_v13, %v214_v12  ;;  %v217_v17 = vld [vmem:[%s977_s1 + $0x18] sm:$0xff]  ;;  %v228_v23 = vadd.s32 4294967288, %v223_v21  ;;  %v235_v25 = vadd.s32 4294967280, %v223_v21  ;;  %v323_v45 = vld [vmem:[%s978_s2] sm:$0x3]  ;;  %s457_s28 = sshll.u32 %s188_s27, 4  ;;  %s925_s28 = int_to_ptr.vmem [resolvable:$true] %s457_s28 }
  0x3d   : > { %v577_v18 = vpack.c.bf16 %v217_v17, %v216_v16  ;;  %v242_v26 = vadd.s32 4294967272, %v223_v21  ;;  %v226_v28 = vsub.s32 %v223_v21, %v225_v22  ;;  %569 = vmatpush3.msk.msra.mxu1 %vm328_vm5, %v323_v45  ;;  %v410_v54 = vsub.s32 0, %v225_v22  ;;  %s549_s29 = sshll.u32 %s784_s16, 10  ;;  %s444_s16 = scalar_lea.sflag [#allocation4], %s867_s5 }
  0x3e   : > { %575 = vmatpush3.bf16.msra.mxu0 %v574_v14  ;;  %v231_v30 = vsub.s32 %v228_v23, %v225_v22  ;;  %v238_v31 = vsub.s32 %v235_v25, %v225_v22  ;;  %s930_s10 = scalar_lea.hbm %s979_s3, %s549_s29  ;;  %s666_s11 = scalar_lea.vmem %s925_s28, 1024 }
  0x3f   : > { %201 = vadd.xlane.f32.xlu0 %v200_v10  ;;  %576 = vmatprep.subr.bf16.mxu0 %v737_v15  ;;  %v245_v34 = vsub.s32 %v242_v26, %v225_v22  ;;  %p667_p6 = scmp.ne.s32.totalorder %s925_s28, %s666_s11  ;;  %p986_p11 = scmp.ne.s32.totalorder %s983_s24, 0 }
  0x40   : > { %207 = vadd.xlane.f32.xlu1 %v206_v11  ;;  %s740_s23 = smov [#allocation5]  }
  0x41   : > { %p668_p12 = pnand %p667_p6, %p986_p11  ;;  %s670_s4 = sshll.u32 %s740_s23, 4  ;;  %s671_s4 = int_to_ptr.vmem [resolvable:$false] %s670_s4 }
  0x42   : > { %578 = vmatpush3.bf16.msra.mxu0 %v577_v18  ;;  %s672_s6 = scalar_lea.vmem %s671_s4, 2048  ;;  %p673_p8 = scmp.lt.s32.totalorder %s925_s28, %s671_s4 }
  0x43   : > { %p669_p13 = pneg %p668_p12  ;;  %p674_p10 = scmp.lt.s32.totalorder %s672_s6, %s666_s11 }
  0x45   : > { %p675_p0 = por %p674_p10, %p673_p8 }
  0x47   : > { %p676_p2 = pnand %p675_p0, %p669_p13 }
  0xc8   : > { %v199_v24 = vpop.xlane.xlu0 %198 }
  0xc9   : > { %v205_v27 = vpop.xlane.xlu1 %204  ;;  %v210_v29 = vmul.f32 0.00390625, %v199_v24 }
  0xca   : > { %v212_v32 = vmul.f32 0.00390625, %v205_v27 }
  0xcb   : > { %v227_v38 = vrot.slane %v210_v29, %v226_v28 }
  0xcc   : > { %v202_v33 = vpop.xlane.xlu0 %201  ;;  %v239_v40 = vrot.slane %v212_v32, %v238_v31 }
  0xcd   : > { %v211_v35 = vmul.f32 0.00390625, %v202_v33  ;;  %v208_v36 = vpop.xlane.xlu1 %207 }
  0xce   : > { %v213_v37 = vmul.f32 0.00390625, %v208_v36 }
  0xcf   : > { %v232_v39 = vrot.slane %v211_v35, %v231_v30 }
  0xd0   : > { %v246_v41 = vrot.slane %v213_v37, %v245_v34 }
  0xd1   : > { %v234_v42 = vsel %vm233_vm1, %v232_v39, %v227_v38 }
  0xd2   : > { %v241_v43 = vsel %vm240_vm2, %v239_v40, %v234_v42 }
  0xd3   : > { %v248_v44 = vsel %vm247_vm3, %v246_v41, %v241_v43 }
  0xd4   : > { %566 = vmatmul.mubr.msk.f32.vlgmr.msra.gmra.mrb[0].mxu0 %vm249_vm4, %v248_v44 }
 0x1a7   : > { %v318_v46 = vpop.f32.mrb[0].mxu0 }
 0x1a8   : > { %v322_v47 = vmax.f32 %v318_v46, 0.0  ;;  %v567_v48 = vpop.f32.mrb[1].mxu0 }
 0x1aa   : > { %571 = vmatmul.mubr.msk.f32.vlgmr.msra.gmra.mrb[0].mxu1 %vm324_vm6, %v322_v47 }
 0x27d   : > { %v398_v49 = vpop.f32.mrb[0].mxu1 }
 0x27e   : > { %v542_v50 = vmul.f32 -1.442695, %v398_v49  ;;  %v572_v51 = vpop.f32.mrb[1].mxu1 }
 0x280   : > { %632 = vpow2.f32 %v542_v50 }
 0x28a   : > { %v633_v52 = vpop.eup %632 }
 0x28b   : > { %v405_v53 = vadd.f32 1.0, %v633_v52 }
 0x28d   : > { %634 = vrcp.f32 %v405_v53 }
 0x297   : > { %v635_v55 = vpop.eup %634 }
 0x298   : > { %v411_v56 = vrot.slane %v635_v55, %v410_v54 }
 0x29a   : > { %417 = vbcast.lane.b32.xlu1 %v411_v56, 264  ;;  %413 = vbcast.lane.b32.xlu0 %v411_v56, 256 }
 0x29e   : > { %421 = vbcast.lane.b32.xlu1 %v411_v56, 272 }
 0x2a2   : > { %425 = vbcast.lane.b32.xlu1 %v411_v56, 280 }
 0x30c   : > { %v418_v57 = vpop.permute.xlu1 %417  ;;  %v414_v58 = vpop.permute.xlu0 %413 }
 0x30d   : > { %v429_v59 = vmul.f32 %v418_v57, %v887_v5  ;;  %v430_v60 = vmul.f32 %v418_v57, %v889_v6  ;;  %v427_v61 = vmul.f32 %v414_v58, %v877_v0  ;;  %v428_v62 = vmul.f32 %v414_v58, %v879_v1 }
 0x30f   : > { %437 = vst [vmem:[%s188_s27 + $0x10] sm:$0xff] %v429_v59  ;;  %438 = vst [vmem:[%s188_s27 + $0x18] sm:$0xff] %v430_v60 }
 0x310   : > { %435 = vst [vmem:[%s188_s27] sm:$0xff] %v427_v61  ;;  %436 = vst [vmem:[%s188_s27 + $0x8] sm:$0xff] %v428_v62  ;;  %v422_v63 = vpop.permute.xlu1 %421 }
 0x311   : > { %v431_v3 = vmul.f32 %v422_v63, %v881_v2  ;;  %v432_v5 = vmul.f32 %v422_v63, %v885_v4 }
 0x313   : > { %439 = vst [vmem:[%s188_s27 + $0x20] sm:$0xff] %v431_v3  ;;  %440 = vst [vmem:[%s188_s27 + $0x28] sm:$0xff] %v432_v5 }
 0x314   : > { %v426_v0 = vpop.permute.xlu1 %425 }
 0x315   : > { %v433_v1 = vmul.f32 %v426_v0, %v893_v8  ;;  %v434_v2 = vmul.f32 %v426_v0, %v895_v9 }
 0x317   : > { %441 = vst [vmem:[%s188_s27 + $0x30] sm:$0xff] %v433_v1  ;;  %442 = vst [vmem:[%s188_s27 + $0x38] sm:$0xff] %v434_v2 }
 0x318   : > { %679 = shalt.err (!%p676_p2)
}
 0x319   : > { %s680_s7 = scalar_lea.hbm %s930_s10, 1024  ;;  %s684_s19 = scalar_lea.hbm %s979_s3, 2048 }
 0x31a   : > { %p681_p4 = scmp.ne.s32.totalorder %s930_s10, %s680_s7  ;;  %p685_p9 = scmp.lt.u32.totalorder %s930_s10, %s979_s3 }
 0x31b   : > { %p686_p1 = scmp.lt.u32.totalorder %s684_s19, %s680_s7  ;;  %p688_p6 = scmp.lt.u32.totalorder %s680_s7, %s930_s10 }
 0x31c   : > { %p682_p5 = pnand %p681_p4, %p986_p11 }
 0x31d   : > { %p687_p3 = por %p686_p1, %p685_p9 }
 0x31e   : > { %p683_p7 = pneg %p682_p5 }
 0x31f   : > { %p689_p12 = por %p688_p6, %p687_p3 }
 0x321   : > { %p690_p13 = pnand %p689_p12, %p683_p7 }
 0x323   : > { %693 = shalt.err (!%p690_p13)
}
 0x324   : > { %s741_s26 = smov 256   ;;  %s742_s27 = smov 16  }
 0x325   : > { %581 = dma.vmem_to_hbm [thread:$0]  (%p986_p11), %s925_s28, 1024, %s930_s10, %s444_s16, %s741_s26, %s741_s26, %s742_s27  }
 0x326 PF: > { %s472_s29 = sand.u32 1, %s720_s12   ;;  %p987_p8 = scmp.ne.s32.totalorder %s984_s25, 0 }
 0x327   : > { %p988_p10 = scmp.ge.s32.totalorder %s732_s15, 2  ;;  %s473_s30 = scalar_lea.sflag [#allocation4], %s472_s29 }
 0x329   : > { %p588_p0 = pnand %p988_p10, %p987_p8 }
 0x32b   : > { %715 = dma.done.wait (!%p588_p0), %s473_s30, 1024  }
 0x32c   : > { %717 = vsyncadd (!%p588_p0), %s473_s30, 4294966272  ;;  %p16_p2 = scmp.ge.s32.totalorder %s788_s18, 4   ;;  %s989_s12 = smov %s724_s13 }
 0x32d   : > { %s990_s13 = smov %s728_s14  ;;  %s991_s14 = smov %s800_s21 }
 0x32e   : > { %s992_s15 = smov %s788_s18  ;;  %18 = sbr.rel (!%p16_p2) target bundleno = 5 (0x5), region = 77 }
 0x335   :  { %478 = vsyncpa [#allocation3], 1 }
 0x336   :  { %480 = vsyncpa [#allocation3 + $0x1], 1 }
 0x337   :  { %481 = vsyncpa [#allocation4], 1 }
 0x338   :  { %483 = vsyncpa [#allocation4 + $0x1], 1 }

</bundles_post_ra>
